<compile_context>
chip_gen: v7x
topology: tpu7x:2x2x1
jax: 0.10.0
libtpu: 0.0.40
codegen_flags: <defaults>
</compile_context>

<pallas_src>
import functools
import math

import jax
import jax.numpy as jnp
import numpy as np
from jax.experimental import pallas as pl
from jax.experimental.pallas import tpu as pltpu

# ------------------------- module hyper-parameters -------------------------
IN_FEATURES = 32
OUT_FEATURES = 16
GRID_SIZE = 5
SPLINE_ORDER = 3
GRID_RANGE = (-1.0, 1.0)
NUM_BASES = GRID_SIZE + SPLINE_ORDER            # 8
NUM_KNOTS = GRID_SIZE + 2 * SPLINE_ORDER + 1    # 12
BN_EPS = 1e-5
PACKED_K = IN_FEATURES * (NUM_BASES + 1)        # 288 = 32 (base) + 256 (spline)

# Default uniform knot grid (same f32 values as the module's `grid` buffer).
H = (GRID_RANGE[1] - GRID_RANGE[0]) / GRID_SIZE
_KNOTS_F32 = (np.arange(-SPLINE_ORDER, GRID_SIZE + SPLINE_ORDER + 1, dtype=np.float32)
              * np.float32(H) + np.float32(GRID_RANGE[0]))
KNOT0 = float(_KNOTS_F32[0])
INV_H = float(1.0 / np.float32(H))

# Pass-1 batch-tile width (lanes).  With the lane-dense layout the per-tile footprint is
# roughly 4-5 KiB per lane (LHS stack + live slabs + double-buffered I/O), so 2048 lanes
# stays around ~10 MiB: safe on v5e/v6e/v7x with the explicit 32 MiB scoped-VMEM limit.
MAX_TILE_LANES = 2048
# Pass-2 (BN affine) tile width: trivially mem-bound, so use big lane-dense blocks.
PASS2_TILE_LANES = 8192


# ------------------------------- Pallas kernels -----------------------------
def kan_fwd_kernel(x_ref, w_ref, y_ref, sum_ref, css_ref, *, total_cols, tile_cols):
    # x_ref:   (IN, TB)        f32   transposed input tile (lane = batch)
    # w_ref:   (OUT, PACKED_K) f32   [base_weight | scaled spline weight, basis-major]
    # y_ref:   (OUT, TB)       f32   pre-BatchNorm linear output (transposed)
    # sum_ref: (1, OUT, 1)     f32   per-tile sum of valid columns
    # css_ref: (1, OUT, 1)     f32   per-tile centered sum of squares
    x = x_ref[...]                                            # (32, TB)

    # ---- base branch: SiLU(x) = x * sigmoid(x); sigmoid via tanh on the EUP ----
    silu_x = x * (0.5 * jnp.tanh(0.5 * x) + 0.5)

    # ---- cubic B-spline bases, uniform-knot closed form ----
    # interval index: x in [knot_c, knot_{c+1})  <=>  c == floor((x - knot_0) / h)
    t = (x - KNOT0) * INV_H
    cell = jnp.floor(t)
    f = t - cell                                              # local coord in [0, 1)
    f2 = f * f
    f3 = f2 * f
    g = 1.0 - f
    g2 = g * g
    g3 = g2 * g
    # the four nonzero segments of the cardinal cubic B-spline at local coordinate f
    p0 = f3 * (1.0 / 6.0)               # contributes to basis j == cell
    p1 = 0.5 * g3 - g2 + (2.0 / 3.0)    # basis j == cell - 1
    p2 = 0.5 * f3 - f2 + (2.0 / 3.0)    # basis j == cell - 2
    p3 = g3 * (1.0 / 6.0)               # basis j == cell - 3
    # shared interval masks; all zero for x outside [knot_0, knot_11) so every basis is
    # zero there, exactly like the reference degree-0 interval tests.
    m = [(cell == float(k)).astype(jnp.float32) for k in range(NUM_KNOTS - 1)]
    bases = [m[j] * p0 + m[j + 1] * p1 + m[j + 2] * p2 + m[j + 3] * p3
             for j in range(NUM_BASES)]                       # 8 x (32, TB)

    # ---- single fused base+spline matmul on the MXU: (16,288) @ (288,TB) ----
    lhs = jnp.concatenate([silu_x] + bases, axis=0)           # (288, TB), sublane-stacked
    y = jnp.dot(w_ref[...], lhs, preferred_element_type=jnp.float32)   # (16, TB)
    y_ref[...] = y

    # ---- per-tile centered BatchNorm statistics (padded batch lanes masked) ----
    col = (jax.lax.broadcasted_iota(jnp.int32, (1, tile_cols), 1)
           + pl.program_id(0) * tile_cols)
    valid = col < total_cols                                  # (1, TB)
    ym = jnp.where(valid, y, 0.0)
    cnt = jnp.sum(valid.astype(jnp.float32), axis=1, keepdims=True)   # (1, 1), >= 1
    s = jnp.sum(ym, axis=1, keepdims=True)                    # (16, 1)
    mu = s * (1.0 / cnt)                                      # per-tile mean
    d = jnp.where(valid, y - mu, 0.0)
    css = jnp.sum(d * d, axis=1, keepdims=True)               # (16, 1)
    sum_ref[...] = s[None, :, :]                              # (1, 16, 1)
    css_ref[...] = css[None, :, :]                            # (1, 16, 1)


def bn_affine_kernel(y_ref, scale_ref, shift_ref, o_ref):
    # y_ref/o_ref: (OUT, TB2) lane-dense; scale/shift: (OUT, 1) broadcast along lanes.
    o_ref[...] = y_ref[...] * scale_ref[...] + shift_ref[...]


# ------------------------------- wrapper ------------------------------------
def _tile_cols(batch):
    lanes = max(128, ((batch + 127) // 128) * 128)            # round up to lane multiple
    if lanes <= 128:
        tb = 128
    else:
        # aim for >= 2 tiles (keeps both v7x TensorCores busy), cap the tile width.
        half = (((lanes + 1) // 2 + 127) // 128) * 128
        tb = min(MAX_TILE_LANES, half)
    padded = ((lanes + tb - 1) // tb) * tb
    return tb, padded


def kan_linear_forward(x, packed_wt, gamma, beta):
    orig_shape = x.shape
    assert orig_shape[-1] == IN_FEATURES
    batch = int(np.prod(orig_shape[:-1]))
    x2 = x.reshape(batch, IN_FEATURES).astype(jnp.float32)

    tb, padded = _tile_cols(batch)
    num_tiles = padded // tb

    # batch-in-lanes layout; pad lanes to the tile multiple (fused with the transpose).
    xt = jnp.pad(x2.T, ((0, 0), (0, padded - batch)))         # (IN, padded)

    # ---- pass 1: fused base + spline linear, plus per-tile centered BN stats ----
    kernel_a = functools.partial(kan_fwd_kernel, total_cols=batch, tile_cols=tb)
    y_t, sums, csss = pl.pallas_call(
        kernel_a,
        out_shape=(jax.ShapeDtypeStruct((OUT_FEATURES, padded), jnp.float32),
                   jax.ShapeDtypeStruct((num_tiles, OUT_FEATURES, 1), jnp.float32),
                   jax.ShapeDtypeStruct((num_tiles, OUT_FEATURES, 1), jnp.float32)),
        grid=(num_tiles,),
        in_specs=[
            pl.BlockSpec((IN_FEATURES, tb), lambda i: (0, i)),
            pl.BlockSpec((OUT_FEATURES, PACKED_K), lambda i: (0, 0)),  # resident weights
        ],
        out_specs=(
            pl.BlockSpec((OUT_FEATURES, tb), lambda i: (0, i)),
            pl.BlockSpec((1, OUT_FEATURES, 1), lambda i: (i, 0, 0)),
            pl.BlockSpec((1, OUT_FEATURES, 1), lambda i: (i, 0, 0)),
        ),
        compiler_params=pltpu.CompilerParams(
            dimension_semantics=("parallel",),
            vmem_limit_bytes=32 * 1024 * 1024),
    )(xt, packed_wt)

    # ---- combine per-tile centered stats (Chan's formula) -> BN scale/shift ----
    n_t = jnp.clip(batch - jnp.arange(num_tiles) * tb, 0, tb).astype(jnp.float32)
    s_t = sums[:, :, 0]                                       # (num_tiles, OUT)
    css_t = csss[:, :, 0]                                     # (num_tiles, OUT)
    mean = jnp.sum(s_t, axis=0) / batch                       # (OUT,)
    mu_t = s_t / n_t[:, None]
    ss = (jnp.sum(css_t, axis=0)
          + jnp.sum(n_t[:, None] * (mu_t - mean[None, :]) ** 2, axis=0))
    var = jnp.maximum(ss / batch, 0.0)                        # biased variance (BN train)
    scale = gamma.reshape(-1) * jax.lax.rsqrt(var + BN_EPS)
    shift = beta.reshape(-1) - mean * scale
    scale2 = scale.reshape(OUT_FEATURES, 1).astype(jnp.float32)
    shift2 = shift.reshape(OUT_FEATURES, 1).astype(jnp.float32)

    # ---- pass 2: BatchNorm affine on the lane-dense y^T, large blocks ----
    tb2 = min(padded, PASS2_TILE_LANES)
    nt2 = (padded + tb2 - 1) // tb2
    out_t = pl.pallas_call(
        bn_affine_kernel,
        out_shape=jax.ShapeDtypeStruct((OUT_FEATURES, padded), jnp.float32),
        grid=(nt2,),
        in_specs=[
            pl.BlockSpec((OUT_FEATURES, tb2), lambda i: (0, i)),
            pl.BlockSpec((OUT_FEATURES, 1), lambda i: (0, 0)),
            pl.BlockSpec((OUT_FEATURES, 1), lambda i: (0, 0)),
        ],
        out_specs=pl.BlockSpec((OUT_FEATURES, tb2), lambda i: (0, i)),
        compiler_params=pltpu.CompilerParams(dimension_semantics=("parallel",)),
    )(y_t, scale2, shift2)

    out = out_t[:, :batch].T                                  # back to (batch, OUT)
    return out.reshape(*orig_shape[:-1], OUT_FEATURES)


# ------------------------- pure-JAX reference (for checking) ----------------
def kan_linear_reference(x, grid, base_weight, scaled_spline_weight, gamma, beta):
    orig_shape = x.shape
    b = int(np.prod(orig_shape[:-1]))
    x2 = x.reshape(b, IN_FEATURES).astype(jnp.float32)

    base_out = jax.nn.silu(x2) @ base_weight.T

    xg = x2[:, :, None]
    g = grid[None, :, :]
    bases = jnp.logical_and(xg >= g[:, :, :-1], xg < g[:, :, 1:]).astype(jnp.float32)
    for k in range(1, SPLINE_ORDER + 1):
        bases = ((xg - g[:, :, :-(k + 1)]) / (g[:, :, k:-1] - g[:, :, :-(k + 1)])
                 * bases[:, :, :-1]
                 + (g[:, :, k + 1:] - xg) / (g[:, :, k + 1:] - g[:, :, 1:-k])
                 * bases[:, :, 1:])
    spline_out = (bases.reshape(b, -1)
                  @ scaled_spline_weight.reshape(OUT_FEATURES, -1).T)
    y = base_out + spline_out

    mean = jnp.mean(y, axis=0, keepdims=True)
    var = jnp.mean((y - mean) ** 2, axis=0, keepdims=True)
    y = (y - mean) * jax.lax.rsqrt(var + BN_EPS) * gamma + beta
    return y.reshape(*orig_shape[:-1], OUT_FEATURES)


# ------------------------- deterministic parameter setup --------------------
def init_params():
    key = jax.random.PRNGKey(0)
    k_base, k_spline, k_scaler = jax.random.split(key, 3)

    # grid buffer: (IN, grid_size + 2*spline_order + 1) — default uniform knots
    grid = jnp.broadcast_to(jnp.asarray(_KNOTS_F32)[None, :], (IN_FEATURES, NUM_KNOTS))

    # base_weight: (OUT, IN), kaiming_uniform(a=sqrt(5)) -> bound = 1/sqrt(IN)
    bound = 1.0 / math.sqrt(IN_FEATURES)
    base_weight = jax.random.uniform(
        k_base, (OUT_FEATURES, IN_FEATURES), jnp.float32, -bound, bound)

    # spline_weight: (OUT, IN, NUM_BASES) — synthetic deterministic init
    # (module init uses an lstsq fit of noise; shapes/scaling are what matter here)
    spline_weight = jax.random.uniform(
        k_spline, (OUT_FEATURES, IN_FEATURES, NUM_BASES), jnp.float32, -0.1, 0.1)

    # spline_scaler: (OUT, IN)
    spline_scaler = jax.random.uniform(
        k_scaler, (OUT_FEATURES, IN_FEATURES), jnp.float32, -bound, bound)

    scaled = spline_weight * spline_scaler[:, :, None]        # (OUT, IN, NB)

    gamma = jnp.ones((1, OUT_FEATURES), jnp.float32)
    beta = jnp.zeros((1, OUT_FEATURES), jnp.float32)
    return grid, base_weight, scaled, gamma, beta


def pack_weights(base_weight, scaled_spline_weight):
    # Kernel LHS rows (transposed layout):
    #   [silu(x) feats 0..31 | basis 0 feats 0..31 | ... | basis 7 feats 0..31]
    # -> packed weight columns follow the same (basis-major, feature-minor) order.
    spline_flat = jnp.transpose(scaled_spline_weight, (0, 2, 1)).reshape(
        OUT_FEATURES, NUM_BASES * IN_FEATURES)
    return jnp.concatenate([base_weight, spline_flat], axis=1)   # (OUT, PACKED_K)


if __name__ == "__main__":
    grid, base_weight, scaled, gamma, beta = init_params()
    packed_wt = pack_weights(base_weight, scaled)

    # small example input: (4, 8, 32) -> flattened batch of 32 rows
    x = jax.random.normal(jax.random.PRNGKey(0), (4, 8, IN_FEATURES), jnp.float32)
    x = jnp.tanh(x)   # keep inputs mostly inside grid_range so the splines are exercised

    out = kan_linear_forward(x, packed_wt, gamma, beta)
    out = jax.block_until_ready(out)

    ref = kan_linear_reference(x, grid, base_weight, scaled, gamma, beta)
    np.testing.assert_allclose(np.asarray(out), np.asarray(ref),
                               rtol=1e-4, atol=1e-4)

    assert out.shape == (4, 8, OUT_FEATURES)
    print("KERNEL_OK")
</pallas_src>

<mosaic_0001>
module attributes {stable_mosaic.version = 11 : i64} {
  func.func @kan_fwd_kernel(%arg0: i32, %arg1: memref<32x128xf32, #tpu.memory_space<vmem>>, %arg2: memref<16x288xf32, #tpu.memory_space<vmem>>, %arg3: memref<16x128xf32, #tpu.memory_space<vmem>>, %arg4: memref<1x16x1xf32, #tpu.memory_space<vmem>>, %arg5: memref<1x16x1xf32, #tpu.memory_space<vmem>>) attributes {dimension_semantics = [#tpu.dimension_semantics<parallel>], iteration_bounds = array<i64: 1>, scalar_prefetch = 0 : i64, scratch_operands = 0 : i64, tpu.core_type = #tpu.core_type<tc>, window_params = [{transform_indices = @transform_0, window_bounds = array<i64: 32, 128>}, {pipeline_mode = #tpu.pipeline_mode<synchronous>, transform_indices = @transform_1, window_bounds = array<i64: 16, 288>}, {transform_indices = @transform_2, window_bounds = array<i64: 16, 128>}, {transform_indices = @transform_3, window_bounds = array<i64: 1, 16, 1>}, {transform_indices = @transform_4, window_bounds = array<i64: 1, 16, 1>}]} {
    %c0 = arith.constant 0 : index
    %c0_0 = arith.constant 0 : index
    %0 = vector.load %arg1[%c0, %c0_0] : memref<32x128xf32, #tpu.memory_space<vmem>>, vector<32x128xf32>
    %cst = arith.constant 5.000000e-01 : f32
    %1 = vector.broadcast %cst : f32 to vector<32x128xf32>
    %2 = arith.mulf %1, %0 : vector<32x128xf32>
    %3 = math.tanh %2 : vector<32x128xf32>
    %cst_1 = arith.constant 5.000000e-01 : f32
    %4 = vector.broadcast %cst_1 : f32 to vector<32x128xf32>
    %5 = arith.mulf %4, %3 : vector<32x128xf32>
    %cst_2 = arith.constant 5.000000e-01 : f32
    %6 = vector.broadcast %cst_2 : f32 to vector<32x128xf32>
    %7 = arith.addf %5, %6 : vector<32x128xf32>
    %8 = arith.mulf %0, %7 : vector<32x128xf32>
    %cst_3 = arith.constant -2.200000e+00 : f32
    %9 = vector.broadcast %cst_3 : f32 to vector<32x128xf32>
    %10 = arith.subf %0, %9 : vector<32x128xf32>
    %cst_4 = arith.constant 2.500000e+00 : f32
    %11 = vector.broadcast %cst_4 : f32 to vector<32x128xf32>
    %12 = arith.mulf %10, %11 : vector<32x128xf32>
    %13 = math.floor %12 : vector<32x128xf32>
    %14 = arith.subf %12, %13 : vector<32x128xf32>
    %15 = arith.mulf %14, %14 : vector<32x128xf32>
    %16 = arith.mulf %15, %14 : vector<32x128xf32>
    %cst_5 = arith.constant 1.000000e+00 : f32
    %17 = vector.broadcast %cst_5 : f32 to vector<32x128xf32>
    %18 = arith.subf %17, %14 : vector<32x128xf32>
    %19 = arith.mulf %18, %18 : vector<32x128xf32>
    %20 = arith.mulf %19, %18 : vector<32x128xf32>
    %cst_6 = arith.constant 0.166666672 : f32
    %21 = vector.broadcast %cst_6 : f32 to vector<32x128xf32>
    %22 = arith.mulf %16, %21 : vector<32x128xf32>
    %cst_7 = arith.constant 5.000000e-01 : f32
    %23 = vector.broadcast %cst_7 : f32 to vector<32x128xf32>
    %24 = arith.mulf %23, %20 : vector<32x128xf32>
    %25 = arith.subf %24, %19 : vector<32x128xf32>
    %cst_8 = arith.constant 0.666666686 : f32
    %26 = vector.broadcast %cst_8 : f32 to vector<32x128xf32>
    %27 = arith.addf %25, %26 : vector<32x128xf32>
    %cst_9 = arith.constant 5.000000e-01 : f32
    %28 = vector.broadcast %cst_9 : f32 to vector<32x128xf32>
    %29 = arith.mulf %28, %16 : vector<32x128xf32>
    %30 = arith.subf %29, %15 : vector<32x128xf32>
    %cst_10 = arith.constant 0.666666686 : f32
    %31 = vector.broadcast %cst_10 : f32 to vector<32x128xf32>
    %32 = arith.addf %30, %31 : vector<32x128xf32>
    %cst_11 = arith.constant 0.166666672 : f32
    %33 = vector.broadcast %cst_11 : f32 to vector<32x128xf32>
    %34 = arith.mulf %20, %33 : vector<32x128xf32>
    %cst_12 = arith.constant 0.000000e+00 : f32
    %35 = vector.broadcast %cst_12 : f32 to vector<32x128xf32>
    %36 = arith.cmpf oeq, %13, %35 : vector<32x128xf32>
    %37 = arith.extui %36 : vector<32x128xi1> to vector<32x128xi32>
    %38 = arith.sitofp %37 : vector<32x128xi32> to vector<32x128xf32>
    %cst_13 = arith.constant 1.000000e+00 : f32
    %39 = vector.broadcast %cst_13 : f32 to vector<32x128xf32>
    %40 = arith.cmpf oeq, %13, %39 : vector<32x128xf32>
    %41 = arith.extui %40 : vector<32x128xi1> to vector<32x128xi32>
    %42 = arith.sitofp %41 : vector<32x128xi32> to vector<32x128xf32>
    %cst_14 = arith.constant 2.000000e+00 : f32
    %43 = vector.broadcast %cst_14 : f32 to vector<32x128xf32>
    %44 = arith.cmpf oeq, %13, %43 : vector<32x128xf32>
    %45 = arith.extui %44 : vector<32x128xi1> to vector<32x128xi32>
    %46 = arith.sitofp %45 : vector<32x128xi32> to vector<32x128xf32>
    %cst_15 = arith.constant 3.000000e+00 : f32
    %47 = vector.broadcast %cst_15 : f32 to vector<32x128xf32>
    %48 = arith.cmpf oeq, %13, %47 : vector<32x128xf32>
    %49 = arith.extui %48 : vector<32x128xi1> to vector<32x128xi32>
    %50 = arith.sitofp %49 : vector<32x128xi32> to vector<32x128xf32>
    %cst_16 = arith.constant 4.000000e+00 : f32
    %51 = vector.broadcast %cst_16 : f32 to vector<32x128xf32>
    %52 = arith.cmpf oeq, %13, %51 : vector<32x128xf32>
    %53 = arith.extui %52 : vector<32x128xi1> to vector<32x128xi32>
    %54 = arith.sitofp %53 : vector<32x128xi32> to vector<32x128xf32>
    %cst_17 = arith.constant 5.000000e+00 : f32
    %55 = vector.broadcast %cst_17 : f32 to vector<32x128xf32>
    %56 = arith.cmpf oeq, %13, %55 : vector<32x128xf32>
    %57 = arith.extui %56 : vector<32x128xi1> to vector<32x128xi32>
    %58 = arith.sitofp %57 : vector<32x128xi32> to vector<32x128xf32>
    %cst_18 = arith.constant 6.000000e+00 : f32
    %59 = vector.broadcast %cst_18 : f32 to vector<32x128xf32>
    %60 = arith.cmpf oeq, %13, %59 : vector<32x128xf32>
    %61 = arith.extui %60 : vector<32x128xi1> to vector<32x128xi32>
    %62 = arith.sitofp %61 : vector<32x128xi32> to vector<32x128xf32>
    %cst_19 = arith.constant 7.000000e+00 : f32
    %63 = vector.broadcast %cst_19 : f32 to vector<32x128xf32>
    %64 = arith.cmpf oeq, %13, %63 : vector<32x128xf32>
    %65 = arith.extui %64 : vector<32x128xi1> to vector<32x128xi32>
    %66 = arith.sitofp %65 : vector<32x128xi32> to vector<32x128xf32>
    %cst_20 = arith.constant 8.000000e+00 : f32
    %67 = vector.broadcast %cst_20 : f32 to vector<32x128xf32>
    %68 = arith.cmpf oeq, %13, %67 : vector<32x128xf32>
    %69 = arith.extui %68 : vector<32x128xi1> to vector<32x128xi32>
    %70 = arith.sitofp %69 : vector<32x128xi32> to vector<32x128xf32>
    %cst_21 = arith.constant 9.000000e+00 : f32
    %71 = vector.broadcast %cst_21 : f32 to vector<32x128xf32>
    %72 = arith.cmpf oeq, %13, %71 : vector<32x128xf32>
    %73 = arith.extui %72 : vector<32x128xi1> to vector<32x128xi32>
    %74 = arith.sitofp %73 : vector<32x128xi32> to vector<32x128xf32>
    %cst_22 = arith.constant 1.000000e+01 : f32
    %75 = vector.broadcast %cst_22 : f32 to vector<32x128xf32>
    %76 = arith.cmpf oeq, %13, %75 : vector<32x128xf32>
    %77 = arith.extui %76 : vector<32x128xi1> to vector<32x128xi32>
    %78 = arith.sitofp %77 : vector<32x128xi32> to vector<32x128xf32>
    %79 = arith.mulf %38, %22 : vector<32x128xf32>
    %80 = arith.mulf %42, %27 : vector<32x128xf32>
    %81 = arith.addf %79, %80 : vector<32x128xf32>
    %82 = arith.mulf %46, %32 : vector<32x128xf32>
    %83 = arith.addf %81, %82 : vector<32x128xf32>
    %84 = arith.mulf %50, %34 : vector<32x128xf32>
    %85 = arith.addf %83, %84 : vector<32x128xf32>
    %86 = arith.mulf %42, %22 : vector<32x128xf32>
    %87 = arith.mulf %46, %27 : vector<32x128xf32>
    %88 = arith.addf %86, %87 : vector<32x128xf32>
    %89 = arith.mulf %50, %32 : vector<32x128xf32>
    %90 = arith.addf %88, %89 : vector<32x128xf32>
    %91 = arith.mulf %54, %34 : vector<32x128xf32>
    %92 = arith.addf %90, %91 : vector<32x128xf32>
    %93 = arith.mulf %46, %22 : vector<32x128xf32>
    %94 = arith.mulf %50, %27 : vector<32x128xf32>
    %95 = arith.addf %93, %94 : vector<32x128xf32>
    %96 = arith.mulf %54, %32 : vector<32x128xf32>
    %97 = arith.addf %95, %96 : vector<32x128xf32>
    %98 = arith.mulf %58, %34 : vector<32x128xf32>
    %99 = arith.addf %97, %98 : vector<32x128xf32>
    %100 = arith.mulf %50, %22 : vector<32x128xf32>
    %101 = arith.mulf %54, %27 : vector<32x128xf32>
    %102 = arith.addf %100, %101 : vector<32x128xf32>
    %103 = arith.mulf %58, %32 : vector<32x128xf32>
    %104 = arith.addf %102, %103 : vector<32x128xf32>
    %105 = arith.mulf %62, %34 : vector<32x128xf32>
    %106 = arith.addf %104, %105 : vector<32x128xf32>
    %107 = arith.mulf %54, %22 : vector<32x128xf32>
    %108 = arith.mulf %58, %27 : vector<32x128xf32>
    %109 = arith.addf %107, %108 : vector<32x128xf32>
    %110 = arith.mulf %62, %32 : vector<32x128xf32>
    %111 = arith.addf %109, %110 : vector<32x128xf32>
    %112 = arith.mulf %66, %34 : vector<32x128xf32>
    %113 = arith.addf %111, %112 : vector<32x128xf32>
    %114 = arith.mulf %58, %22 : vector<32x128xf32>
    %115 = arith.mulf %62, %27 : vector<32x128xf32>
    %116 = arith.addf %114, %115 : vector<32x128xf32>
    %117 = arith.mulf %66, %32 : vector<32x128xf32>
    %118 = arith.addf %116, %117 : vector<32x128xf32>
    %119 = arith.mulf %70, %34 : vector<32x128xf32>
    %120 = arith.addf %118, %119 : vector<32x128xf32>
    %121 = arith.mulf %62, %22 : vector<32x128xf32>
    %122 = arith.mulf %66, %27 : vector<32x128xf32>
    %123 = arith.addf %121, %122 : vector<32x128xf32>
    %124 = arith.mulf %70, %32 : vector<32x128xf32>
    %125 = arith.addf %123, %124 : vector<32x128xf32>
    %126 = arith.mulf %74, %34 : vector<32x128xf32>
    %127 = arith.addf %125, %126 : vector<32x128xf32>
    %128 = arith.mulf %66, %22 : vector<32x128xf32>
    %129 = arith.mulf %70, %27 : vector<32x128xf32>
    %130 = arith.addf %128, %129 : vector<32x128xf32>
    %131 = arith.mulf %74, %32 : vector<32x128xf32>
    %132 = arith.addf %130, %131 : vector<32x128xf32>
    %133 = arith.mulf %78, %34 : vector<32x128xf32>
    %134 = arith.addf %132, %133 : vector<32x128xf32>
    %135 = tpu.concatenate %8, %85, %92, %99, %106, %113, %120, %127, %134 in 0 : vector<32x128xf32>, vector<32x128xf32>, vector<32x128xf32>, vector<32x128xf32>, vector<32x128xf32>, vector<32x128xf32>, vector<32x128xf32>, vector<32x128xf32>, vector<32x128xf32> -> vector<288x128xf32>
    %c0_23 = arith.constant 0 : index
    %c0_24 = arith.constant 0 : index
    %136 = vector.load %arg2[%c0_23, %c0_24] : memref<16x288xf32, #tpu.memory_space<vmem>>, vector<16x288xf32>
    %cst_25 = arith.constant dense<0.000000e+00> : vector<16x128xf32>
    %137 = tpu.matmul %136, %135, %cst_25 {dimension_numbers = #tpu.dot_dimension_numbers<[1], [0], [0], [1], [0, 0, 1, 1], [], []>} : vector<16x288xf32>, vector<288x128xf32>, vector<16x128xf32> -> vector<16x128xf32>
    %c0_26 = arith.constant 0 : index
    %c0_27 = arith.constant 0 : index
    %138 = vector.load %arg3[%c0_26, %c0_27] : memref<16x128xf32, #tpu.memory_space<vmem>>, vector<16x128xf32>
    tpu.vector_store %arg3[%c0_26, %c0_27], %137 {strides = array<i32>} : memref<16x128xf32, #tpu.memory_space<vmem>>, vector<16x128xf32>,
    %139 = tpu.iota {dimensions = array<i32: 1>} : vector<1x128xi32>
    %c128_i32 = arith.constant 128 : i32
    %140 = arith.muli %arg0, %c128_i32 : i32
    %141 = vector.broadcast %140 : i32 to vector<1x128xi32>
    %142 = arith.addi %139, %141 : vector<1x128xi32>
    %c32_i32 = arith.constant 32 : i32
    %143 = vector.broadcast %c32_i32 : i32 to vector<1x128xi32>
    %144 = arith.cmpi slt, %142, %143 : vector<1x128xi32>
    %cst_28 = arith.constant 0.000000e+00 : f32
    %145 = vector.shape_cast %144 : vector<1x128xi1> to vector<1x128xi1>
    %146 = vector.broadcast %145 : vector<1x128xi1> to vector<16x128xi1>
    %147 = vector.broadcast %cst_28 : f32 to vector<16x128xf32>
    %148 = arith.select %146, %137, %147 : vector<16x128xi1>, vector<16x128xf32>
    %149 = arith.extui %144 : vector<1x128xi1> to vector<1x128xi32>
    %150 = arith.sitofp %149 : vector<1x128xi32> to vector<1x128xf32>
    %cst_29 = arith.constant dense<0.000000e+00> : vector<1xf32>
    %151 = vector.multi_reduction <add>, %150, %cst_29 [1] : vector<1x128xf32> to vector<1xf32>
    %152 = vector.shape_cast %151 : vector<1xf32> to vector<1x1xf32>
    %cst_30 = arith.constant dense<0.000000e+00> : vector<16xf32>
    %153 = vector.multi_reduction <add>, %148, %cst_30 [1] : vector<16x128xf32> to vector<16xf32>
    %154 = vector.shape_cast %153 : vector<16xf32> to vector<16x1xf32>
    %cst_31 = arith.constant 1.000000e+00 : f32
    %155 = vector.broadcast %cst_31 : f32 to vector<1x1xf32>
    %156 = arith.divf %155, %152 : vector<1x1xf32>
    %157 = vector.broadcast %156 : vector<1x1xf32> to vector<16x1xf32>
    %158 = arith.mulf %154, %157 : vector<16x1xf32>
    %159 = vector.broadcast %158 : vector<16x1xf32> to vector<16x128xf32>
    %160 = arith.subf %137, %159 : vector<16x128xf32>
    %cst_32 = arith.constant 0.000000e+00 : f32
    %161 = vector.shape_cast %144 : vector<1x128xi1> to vector<1x128xi1>
    %162 = vector.broadcast %161 : vector<1x128xi1> to vector<16x128xi1>
    %163 = vector.broadcast %cst_32 : f32 to vector<16x128xf32>
    %164 = arith.select %162, %160, %163 : vector<16x128xi1>, vector<16x128xf32>
    %165 = arith.mulf %164, %164 : vector<16x128xf32>
    %cst_33 = arith.constant dense<0.000000e+00> : vector<16xf32>
    %166 = vector.multi_reduction <add>, %165, %cst_33 [1] : vector<16x128xf32> to vector<16xf32>
    %167 = vector.shape_cast %166 : vector<16xf32> to vector<16x1xf32>
    %168 = vector.shape_cast %154 : vector<16x1xf32> to vector<1x16x1xf32>
    %c0_34 = arith.constant 0 : index
    %c0_35 = arith.constant 0 : index
    %c0_36 = arith.constant 0 : index
    %169 = vector.load %arg4[%c0_34, %c0_35, %c0_36] : memref<1x16x1xf32, #tpu.memory_space<vmem>>, vector<1x16x1xf32>
    tpu.vector_store %arg4[%c0_34, %c0_35, %c0_36], %168 {strides = array<i32>} : memref<1x16x1xf32, #tpu.memory_space<vmem>>, vector<1x16x1xf32>,
    %170 = vector.shape_cast %167 : vector<16x1xf32> to vector<1x16x1xf32>
    %c0_37 = arith.constant 0 : index
    %c0_38 = arith.constant 0 : index
    %c0_39 = arith.constant 0 : index
    %171 = vector.load %arg5[%c0_37, %c0_38, %c0_39] : memref<1x16x1xf32, #tpu.memory_space<vmem>>, vector<1x16x1xf32>
    tpu.vector_store %arg5[%c0_37, %c0_38, %c0_39], %170 {strides = array<i32>} : memref<1x16x1xf32, #tpu.memory_space<vmem>>, vector<1x16x1xf32>,
    return
  }
  func.func @transform_0(%arg0: i32) -> (i32, i32) {
    %c0_i32 = arith.constant 0 : i32
    %c0_i32_0 = arith.constant 0 : i32
    return %c0_i32, %arg0 : i32, i32
  }
  func.func @transform_1(%arg0: i32) -> (i32, i32) {
    %c0_i32 = arith.constant 0 : i32
    %c0_i32_0 = arith.constant 0 : i32
    %c0_i32_1 = arith.constant 0 : i32
    return %c0_i32, %c0_i32_0 : i32, i32
  }
  func.func @transform_2(%arg0: i32) -> (i32, i32) {
    %c0_i32 = arith.constant 0 : i32
    %c0_i32_0 = arith.constant 0 : i32
    return %c0_i32, %arg0 : i32, i32
  }
  func.func @transform_3(%arg0: i32) -> (i32, i32, i32) {
    %c0_i32 = arith.constant 0 : i32
    %c0_i32_0 = arith.constant 0 : i32
    %c0_i32_1 = arith.constant 0 : i32
    return %arg0, %c0_i32, %c0_i32_0 : i32, i32, i32
  }
  func.func @transform_4(%arg0: i32) -> (i32, i32, i32) {
    %c0_i32 = arith.constant 0 : i32
    %c0_i32_0 = arith.constant 0 : i32
    %c0_i32_1 = arith.constant 0 : i32
    return %arg0, %c0_i32, %c0_i32_0 : i32, i32, i32
  }
}

</mosaic_0001>

<bundles_post_ra>
// kernel: tpu_custom_call.1
= control target key start
LH: loop header
LB: loop body
LE: loop exit
PB: predicated region body
PF: predicated region fallthrough
CT: control target
= control target key end

     0   :  { %10 = vsyncpa [#allocation3], 0  ;;  %s1535_s0 = inlined_call_operand.hbm [shape: f32[32,128], index: 0, kind: input, shape index: {}]   ;;  %s1536_s1 = inlined_call_operand.hbm [shape: f32[16,288], index: 1, kind: input, shape index: {}]   ;;  %s1537_s2 = inlined_call_operand.hbm [shape: f32[16,128], index: 2, kind: output, shape index: {0}]   ;;  %s1538_s3 = inlined_call_operand.vmem [shape: f32[1,16,1], index: 3, kind: output, shape index: {1}]   ;;  %s1539_s4 = inlined_call_operand.vmem [shape: f32[1,16,1], index: 4, kind: output, shape index: {2}]  }
   0x1   :  { %11 = vsyncpa [#allocation6], 0 }
   0x2   :  { %12 = vsyncpa [#allocation4], 0  ;;  %s954_s15 = smov [#allocation2]   ;;  %s882_s19 = scalar_lea.hbm %s1535_s0, 512 }
   0x3   :  { %s18_s16 = sshll.u32 %s954_s15, 4  ;;  %p883_p0 = scmp.ne.s32.totalorder %s1535_s0, %s882_s19  ;;  %s19_s16 = int_to_ptr.vmem [resolvable:$true] %s18_s16 }
   0x4   :  { %p886_p1 = scmp.lt.u32.totalorder %s882_s19, %s1535_s0 }
   0x6   :  { %p888_p2 = pnand %p886_p1, %p883_p0 }
   0x8   :  { %891 = shalt.err (!%p888_p2)
}
   0x9   :  { %s892_s24 = scalar_lea.vmem %s19_s16, 512  ;;  %p897_p4 = scmp.lt.s32.totalorder %s19_s16, %s19_s16 }
   0xa   :  { %p893_p3 = scmp.ne.s32.totalorder %s19_s16, %s892_s24  ;;  %p898_p5 = scmp.lt.s32.totalorder %s892_s24, %s892_s24 }
   0xc   :  { %p899_p6 = por %p898_p5, %p897_p4 }
   0xe   :  { %p900_p7 = pnand %p899_p6, %p893_p3 }
  0x10   :  { %903 = shalt.err (!%p900_p7)
}
  0x11   :  { %s955_s25 = smov 128   ;;  %s956_s26 = smov 8  }
  0x12   :  { %24 = dma.hbm_to_vmem [thread:$0]  %s1535_s0, 512, %s19_s16, [#allocation3], %s955_s25, %s955_s25, %s956_s26  }
  0x13   :  { %s957_s29 = smov [#allocation5]   ;;  %s904_s7 = scalar_lea.hbm %s1536_s1, 768 }
  0x14   :  { %s30_s30 = sshll.u32 %s957_s29, 4  ;;  %p905_p8 = scmp.ne.s32.totalorder %s1536_s1, %s904_s7  ;;  %s31_s30 = int_to_ptr.vmem [resolvable:$true] %s30_s30 }
  0x15   :  { %p908_p9 = scmp.lt.u32.totalorder %s904_s7, %s1536_s1 }
  0x17   :  { %p910_p10 = pnand %p908_p9, %p905_p8 }
  0x19   :  { %913 = shalt.err (!%p910_p10)
}
  0x1a   :  { %s914_s12 = scalar_lea.vmem %s31_s30, 768  ;;  %p919_p12 = scmp.lt.s32.totalorder %s31_s30, %s31_s30 }
  0x1b   :  { %p915_p11 = scmp.ne.s32.totalorder %s31_s30, %s914_s12  ;;  %p920_p13 = scmp.lt.s32.totalorder %s914_s12, %s914_s12 }
  0x1d   :  { %p921_p0 = por %p920_p13, %p919_p12 }
  0x1f   :  { %p922_p1 = pnand %p921_p0, %p915_p11 }
  0x21   :  { %925 = shalt.err (!%p922_p1)
}
  0x22   :  { %s958_s0 = smov 384   ;;  %s959_s13 = smov 24  }
  0x23   :  { %36 = dma.hbm_to_vmem [thread:$0]  %s1536_s1, 768, %s31_s30, [#allocation6], %s958_s0, %s958_s0, %s959_s13  }
  0x24   :  { %948 = dma.done.wait [#allocation3], 512  }
  0x25   :  { %949 = vsyncadd [#allocation3], 4294966784 }
  0x26   :  { %950 = dma.done.wait [#allocation6], 768  }
  0x27   :  { %951 = vsyncadd [#allocation6], 4294966528  ;;  %v656_v0 = vlaneseq  ;;  %v1540_v2 = vmov 0.0   ;;  %v1020_v4 = vld [vmem:[#allocation2] sm:$0xff]  ;;  %v1022_v5 = vld [vmem:[#allocation2 + $0x8] sm:$0xff]  ;;  %vm497_vm1 = vcmask 261120  }
  0x28   :  { %v1024_v6 = vld [vmem:[#allocation2 + $0x10] sm:$0xff]  ;;  %v718_v7 = vadd.f32 2.2, %v1020_v4  ;;  %v719_v8 = vadd.f32 2.2, %v1022_v5  ;;  %v47_v9 = vmul.f32 0.5, %v1020_v4 }
  0x29   :  { %v1014_v1 = vand.u32 127, %v656_v0  ;;  %v48_v10 = vmul.f32 0.5, %v1022_v5  ;;  %v1030_v11 = vld [vmem:[#allocation2 + $0x18] sm:$0xff]  ;;  %v720_v12 = vadd.f32 2.2, %v1024_v6  ;;  %v49_v13 = vmul.f32 0.5, %v1024_v6 }
  0x2a   :  { %v492_v14 = vld [vmem:[#allocation5 + $0x8] sm:$0xff]  ;;  %v71_v15 = vmul.f32 2.5, %v718_v7  ;;  %v72_v16 = vmul.f32 2.5, %v719_v8  ;;  %872 = vtanh.f32 %v47_v9  ;;  %v721_v17 = vadd.f32 2.2, %v1030_v11  ;;  %v493_v18 = vld [vmem:[#allocation5 + $0x10] sm:$0xff] }
  0x2b   :  { %1557 = vst [vmem:[#allocation11_spill] sm:$0xff] %v1014_v1  ;;  %vm661_vm0 = vcmp.lt.s32.totalorder %v1014_v1, 32  ;;  %568 = vmatprep.mubr.f32.mxu0 %v492_v14  ;;  %874 = vtanh.f32 %v48_v10  ;;  %v1035_v19 = vmul.f32 2.5, %v720_v12  ;;  %v50_v20 = vmul.f32 0.5, %v1030_v11  ;;  %821 = vmatprep.mubr.msk.f32.mxu1 %vm497_vm1, %v493_v18  ;;  %s961_s19 = smov [#allocation7]  }
  0x2c   :  { %v768_v3 = vsel %vm661_vm0, 1.0, %v1540_v2  ;;  %v1039_v21 = vfloor.f32 %v71_v15  ;;  %v1041_v22 = vfloor.f32 %v72_v16  ;;  %876 = vtanh.f32 %v49_v13  ;;  %s697_s20 = sshll.u32 %s961_s19, 4  ;;  %s698_s20 = int_to_ptr.vmem [resolvable:$true] %s697_s20 }
  0x2d   :  { %667 = vadd.xlane.f32.xlu0 %v768_v3  ;;  %v1043_v23 = vmul.f32 2.5, %v721_v17  ;;  %v1046_v24 = vfloor.f32 %v1035_v19  ;;  %878 = vtanh.f32 %v50_v20  ;;  %v1567_v1 = vmov 0.0   ;;  %s926_s21 = scalar_lea.vmem %s698_s20, 256  ;;  %p931_p3 = scmp.lt.s32.totalorder %s698_s20, %s698_s20 }
  0x2e   :  { %v79_v25 = vsub.f32 %v71_v15, %v1039_v21  ;;  %v80_v26 = vsub.f32 %v72_v16, %v1041_v22  ;;  %vm171_vm2 = vcmp.eq.f32.partialorder %v1039_v21, 3.0  ;;  %vm172_vm3 = vcmp.eq.f32.partialorder %v1041_v22, 3.0  ;;  %p927_p2 = scmp.ne.s32.totalorder %s698_s20, %s926_s21  ;;  %p932_p4 = scmp.lt.s32.totalorder %s926_s21, %s926_s21 }
  0x2f   :  { %v1053_v27 = vsel %vm171_vm2, 1.0, %v1540_v2  ;;  %v1056_v28 = vsel %vm172_vm3, 1.0, %v1540_v2  ;;  %vm183_vm4 = vcmp.eq.f32.partialorder %v1039_v21, 4.0  ;;  %vm184_vm5 = vcmp.eq.f32.partialorder %v1041_v22, 4.0 }
  0x30   :  { %v83_v29 = vmul.f32 %v79_v25, %v79_v25  ;;  %v84_v30 = vmul.f32 %v80_v26, %v80_v26  ;;  %v91_v31 = vsub.f32 1.0, %v79_v25  ;;  %v92_v32 = vsub.f32 1.0, %v80_v26  ;;  %p933_p5 = por %p932_p4, %p931_p3 }
  0x31   :  { %v1061_v33 = vsel %vm183_vm4, 1.0, %v1540_v2  ;;  %v1064_v34 = vsel %vm184_vm5, 1.0, %v1540_v2  ;;  %vm195_vm6 = vcmp.eq.f32.partialorder %v1039_v21, 5.0  ;;  %vm196_vm7 = vcmp.eq.f32.partialorder %v1041_v22, 5.0 }
  0x32   :  { %v87_v35 = vmul.f32 %v83_v29, %v79_v25  ;;  %v88_v36 = vmul.f32 %v84_v30, %v80_v26  ;;  %v95_v37 = vmul.f32 %v91_v31, %v91_v31  ;;  %v96_v38 = vmul.f32 %v92_v32, %v92_v32  ;;  %p934_p6 = pnand %p933_p5, %p927_p2 }
  0x33   :  { %v1069_v39 = vsel %vm195_vm6, 1.0, %v1540_v2  ;;  %v1072_v40 = vsel %vm196_vm7, 1.0, %v1540_v2  ;;  %vm207_vm8 = vcmp.eq.f32.partialorder %v1039_v21, 6.0  ;;  %vm208_vm9 = vcmp.eq.f32.partialorder %v1041_v22, 6.0 }
  0x34   :  { %1558 = vst [vmem:[#allocation12_spill] sm:$0xff] %v1069_v39  ;;  %1559 = vst [vmem:[#allocation13_spill] sm:$0xff] %v1072_v40  ;;  %v873_v41 = vpop.eup %872  ;;  %v99_v42 = vmul.f32 %v95_v37, %v91_v31  ;;  %v100_v43 = vmul.f32 %v96_v38, %v92_v32  ;;  %v1076_v44 = vmul.f32 0.16666667, %v87_v35  ;;  %v1078_v45 = vmul.f32 0.16666667, %v88_v36 }
  0x35   :  { %v875_v46 = vpop.eup %874  ;;  %v119_v47 = vmul.f32 0.5, %v87_v35  ;;  %v120_v48 = vmul.f32 0.5, %v88_v36  ;;  %v1081_v49 = vsel %vm207_vm8, 1.0, %v1540_v2  ;;  %v1084_v50 = vsel %vm208_vm9, 1.0, %v1540_v2 }
  0x36   :  { %1560 = vst [vmem:[#allocation14_spill] sm:$0xff] %v1081_v49  ;;  %v1086_v51 = vpop.eup %876  ;;  %v107_v52 = vmul.f32 0.5, %v99_v42  ;;  %v108_v53 = vmul.f32 0.5, %v100_v43  ;;  %v1088_v54 = vmul.f32 0.16666667, %v99_v42  ;;  %v351_v59 = vmul.f32 %v1053_v27, %v1076_v44 }
  0x37   :  { %v1090_v55 = vmul.f32 0.16666667, %v100_v43  ;;  %v1092_v56 = vpop.eup %878  ;;  %v123_v57 = vsub.f32 %v119_v47, %v83_v29  ;;  %v124_v58 = vsub.f32 %v120_v48, %v84_v30  ;;  %v352_v60 = vmul.f32 %v1056_v28, %v1078_v45 }
  0x38   :  { %v111_v61 = vsub.f32 %v107_v52, %v95_v37  ;;  %v112_v62 = vsub.f32 %v108_v53, %v96_v38  ;;  %v371_v63 = vmul.f32 %v1081_v49, %v1088_v54  ;;  %v55_v8 = vmul.f32 0.5, %v873_v41 }
  0x39   :  { %v372_v0 = vmul.f32 %v1084_v50, %v1090_v55  ;;  %v1102_v3 = vadd.f32 0.6666667, %v123_v57  ;;  %v1104_v7 = vadd.f32 0.6666667, %v124_v58  ;;  %v56_v9 = vmul.f32 0.5, %v875_v46 }
  0x3a   :  { %v1106_v10 = vadd.f32 0.6666667, %v111_v61  ;;  %v1108_v12 = vadd.f32 0.6666667, %v112_v62  ;;  %v1111_v13 = vfloor.f32 %v1043_v23  ;;  %v81_v14 = vsub.f32 %v1035_v19, %v1046_v24 }
  0x3b   :  { %v363_v15 = vmul.f32 %v1069_v39, %v1102_v3  ;;  %v364_v16 = vmul.f32 %v1072_v40, %v1104_v7  ;;  %v59_v17 = vadd.f32 0.5, %v55_v8  ;;  %v60_v18 = vadd.f32 0.5, %v56_v9 }
  0x3c   :  { %v355_v20 = vmul.f32 %v1061_v33, %v1106_v10  ;;  %v356_v25 = vmul.f32 %v1064_v34, %v1108_v12  ;;  %v82_v26 = vsub.f32 %v1043_v23, %v1111_v13  ;;  %v85_v29 = vmul.f32 %v81_v14, %v81_v14 }
  0x3d   :  { %v63_v19 = vmul.f32 %v59_v17, %v1020_v4  ;;  %v64_v30 = vmul.f32 %v60_v18, %v1022_v5  ;;  %v93_v31 = vsub.f32 1.0, %v81_v14  ;;  %vm173_vm10 = vcmp.eq.f32.partialorder %v1046_v24, 3.0 }
  0x3e   :  { %v359_v32 = vadd.f32 %v355_v20, %v351_v59  ;;  %v360_v35 = vadd.f32 %v356_v25, %v352_v60  ;;  %v86_v36 = vmul.f32 %v82_v26, %v82_v26  ;;  %v89_v37 = vmul.f32 %v85_v29, %v81_v14 }
  0x3f   :  { %v826_v38 = vpack.c.bf16 %v64_v30, %v63_v19  ;;  %v94_v41 = vsub.f32 1.0, %v82_v26  ;;  %v97_v42 = vmul.f32 %v93_v31, %v93_v31  ;;  %vm174_vm11 = vcmp.eq.f32.partialorder %v1111_v13, 3.0 }
  0x40   :  { %v367_v43 = vadd.f32 %v363_v15, %v359_v32  ;;  %v368_v46 = vadd.f32 %v364_v16, %v360_v35  ;;  %v90_v23 = vmul.f32 %v86_v36, %v82_v26  ;;  %v1129_v47 = vmul.f32 0.16666667, %v89_v37 }
  0x41   :  { %v98_v4 = vmul.f32 %v94_v41, %v94_v41  ;;  %v101_v48 = vmul.f32 %v97_v42, %v93_v31  ;;  %v121_v5 = vmul.f32 0.5, %v89_v37  ;;  %v1134_v52 = vsel %vm173_vm10, 1.0, %v1540_v2 }
  0x42   :  { %v375_v53 = vadd.f32 %v371_v63, %v367_v43  ;;  %v376_v57 = vadd.f32 %v372_v0, %v368_v46  ;;  %v1136_v58 = vmul.f32 0.16666667, %v90_v23  ;;  %v122_v59 = vmul.f32 0.5, %v90_v23 }
  0x43   :  { %v102_v60 = vmul.f32 %v98_v4, %v94_v41  ;;  %v109_v61 = vmul.f32 0.5, %v101_v48  ;;  %v125_v62 = vsub.f32 %v121_v5, %v85_v29  ;;  %v1138_v8 = vmul.f32 0.16666667, %v101_v48 }
  0x44   :  { %v824_v9 = vpack.c.bf16 %v376_v57, %v375_v53  ;;  %v126_v14 = vsub.f32 %v122_v59, %v86_v36  ;;  %v1143_v15 = vsel %vm174_vm11, 1.0, %v1540_v2  ;;  %vm185_vm12 = vcmp.eq.f32.partialorder %v1046_v24, 4.0 }
  0x45   :  { %v110_v16 = vmul.f32 0.5, %v102_v60  ;;  %v113_v63 = vsub.f32 %v109_v61, %v97_v42  ;;  %v1146_v0 = vadd.f32 0.6666667, %v125_v62  ;;  %v1148_v17 = vmul.f32 0.16666667, %v102_v60 }
  0x46   :  { %825 = vmatprep.subr.bf16.mxu0 %v824_v9  ;;  %v1150_v18 = vadd.f32 0.6666667, %v126_v14  ;;  %vm186_vm13 = vcmp.eq.f32.partialorder %v1111_v13, 4.0  ;;  %v1154_v20 = vsel %vm185_vm12, 1.0, %v1540_v2  ;;  %vm197_vm14 = vcmp.eq.f32.partialorder %v1046_v24, 5.0 }
  0x47   :  { %1561 = vst [vmem:[#allocation15_spill] sm:$0xff] %v1154_v20  ;;  %827 = vmatpush3.bf16.msra.mxu0 %v826_v38  ;;  %v114_v25 = vsub.f32 %v110_v16, %v98_v4  ;;  %v1157_v26 = vadd.f32 0.6666667, %v113_v63  ;;  %v1160_v29 = vsel %vm186_vm13, 1.0, %v1540_v2  ;;  %vm198_vm15 = vcmp.eq.f32.partialorder %v1111_v13, 5.0 }
  0x48   :  { %1562 = vst [vmem:[#allocation16_spill] sm:$0xff] %v1160_v29  ;;  %v1164_v19 = vsel %vm197_vm14, 1.0, %v1540_v2  ;;  %v1167_v30 = vsel %vm198_vm15, 1.0, %v1540_v2  ;;  %vm209_vm2 = vcmp.eq.f32.partialorder %v1046_v24, 6.0  ;;  %vm210_vm3 = vcmp.eq.f32.partialorder %v1111_v13, 6.0 }
  0x49   :  { %1563 = vst [vmem:[#allocation17_spill] sm:$0xff] %v1164_v19  ;;  %1564 = vst [vmem:[#allocation18_spill] sm:$0xff] %v1167_v30  ;;  %v1171_v31 = vadd.f32 0.6666667, %v114_v25  ;;  %v1174_v32 = vsel %vm209_vm2, 1.0, %v1540_v2  ;;  %v1177_v35 = vsel %vm210_vm3, 1.0, %v1540_v2  ;;  %v353_v36 = vmul.f32 %v1134_v52, %v1129_v47 }
  0x4a   :  { %v354_v37 = vmul.f32 %v1143_v15, %v1136_v58  ;;  %v357_v38 = vmul.f32 %v1154_v20, %v1157_v26  ;;  %v365_v41 = vmul.f32 %v1164_v19, %v1146_v0  ;;  %v366_v42 = vmul.f32 %v1167_v30, %v1150_v18 }
  0x4b   :  { %v358_v43 = vmul.f32 %v1160_v29, %v1171_v31  ;;  %v373_v46 = vmul.f32 %v1174_v32, %v1138_v8  ;;  %v374_v23 = vmul.f32 %v1177_v35, %v1148_v17  ;;  %v57_v4 = vmul.f32 0.5, %v1086_v51 }
  0x4c   :  { %v361_v48 = vadd.f32 %v357_v38, %v353_v36  ;;  %v58_v5 = vmul.f32 0.5, %v1092_v56  ;;  %vm219_vm4 = vcmp.eq.f32.partialorder %v1039_v21, 7.0  ;;  %vm220_vm5 = vcmp.eq.f32.partialorder %v1041_v22, 7.0 }
  0x4d   :  { %v362_v53 = vadd.f32 %v358_v43, %v354_v37  ;;  %v61_v57 = vadd.f32 0.5, %v57_v4  ;;  %v1200_v59 = vsel %vm219_vm4, 1.0, %v1540_v2  ;;  %v1203_v60 = vsel %vm220_vm5, 1.0, %v1540_v2 }
  0x4e   :  { %1565 = vst [vmem:[#allocation19_spill] sm:$0xff] %v1200_v59  ;;  %1566 = vst [vmem:[#allocation20_spill] sm:$0xff] %v1203_v60  ;;  %v369_v61 = vadd.f32 %v365_v41, %v361_v48  ;;  %v62_v62 = vadd.f32 0.5, %v58_v5  ;;  %v379_v51 = vmul.f32 %v1061_v33, %v1076_v44  ;;  %v380_v56 = vmul.f32 %v1064_v34, %v1078_v45 }
  0x4f   :  { %v370_v9 = vadd.f32 %v366_v42, %v362_v53  ;;  %v65_v14 = vmul.f32 %v61_v57, %v1024_v6  ;;  %v383_v16 = vmul.f32 %v1069_v39, %v1106_v10  ;;  %v384_v63 = vmul.f32 %v1072_v40, %v1108_v12 }
  0x50   :  { %v377_v25 = vadd.f32 %v373_v46, %v369_v61  ;;  %v66_v36 = vmul.f32 %v62_v62, %v1030_v11  ;;  %v391_v37 = vmul.f32 %v1081_v49, %v1102_v3  ;;  %v392_v38 = vmul.f32 %v1084_v50, %v1104_v7 }
  0x51   :  { %v378_v41 = vadd.f32 %v374_v23, %v370_v9  ;;  %v387_v43 = vadd.f32 %v383_v16, %v379_v51  ;;  %v388_v42 = vadd.f32 %v384_v63, %v380_v56  ;;  %v399_v6 = vmul.f32 %v1200_v59, %v1088_v54 }
  0x52   :  { %v830_v4 = vpack.c.bf16 %v66_v36, %v65_v14  ;;  %v400_v48 = vmul.f32 %v1203_v60, %v1090_v55  ;;  %vm135_vm6 = vcmp.eq.f32.partialorder %v1039_v21, 0.0  ;;  %vm136_vm7 = vcmp.eq.f32.partialorder %v1041_v22, 0.0 }
  0x53   :  { %v828_v11 = vpack.c.bf16 %v378_v41, %v377_v25  ;;  %v395_v46 = vadd.f32 %v391_v37, %v387_v43  ;;  %v396_v5 = vadd.f32 %v392_v38, %v388_v42  ;;  %v722_v53 = vsel %vm135_vm6, 1.0, %v1540_v2 }
  0x54   :  { %v723_v23 = vsel %vm136_vm7, 1.0, %v1540_v2  ;;  %vm147_vm8 = vcmp.eq.f32.partialorder %v1039_v21, 1.0  ;;  %vm148_vm9 = vcmp.eq.f32.partialorder %v1041_v22, 1.0  ;;  %vm159_vm10 = vcmp.eq.f32.partialorder %v1039_v21, 2.0 }
  0x55   :  { %829 = vmatprep.subr.bf16.mxu0 %v828_v11  ;;  %v403_v57 = vadd.f32 %v399_v6, %v395_v46  ;;  %v404_v61 = vadd.f32 %v400_v48, %v396_v5  ;;  %v1231_v62 = vsel %vm147_vm8, 1.0, %v1540_v2  ;;  %v1234_v51 = vsel %vm148_vm9, 1.0, %v1540_v2 }
  0x56   :  { %831 = vmatpush3.bf16.msra.mxu0 %v830_v4  ;;  %vm160_vm11 = vcmp.eq.f32.partialorder %v1041_v22, 2.0  ;;  %v1238_v56 = vsel %vm159_vm10, 1.0, %v1540_v2  ;;  %v267_v9 = vmul.f32 %v722_v53, %v1076_v44  ;;  %v268_v14 = vmul.f32 %v723_v23, %v1078_v45 }
  0x57   :  { %v832_v16 = vpack.c.bf16 %v404_v61, %v403_v57  ;;  %v1243_v63 = vsel %vm160_vm11, 1.0, %v1540_v2  ;;  %v271_v25 = vmul.f32 %v1231_v62, %v1106_v10  ;;  %v272_v36 = vmul.f32 %v1234_v51, %v1108_v12 }
  0x58   :  { %v279_v37 = vmul.f32 %v1238_v56, %v1102_v3  ;;  %v280_v38 = vmul.f32 %v1243_v63, %v1104_v7  ;;  %v287_v41 = vmul.f32 %v1053_v27, %v1088_v54  ;;  %v288_v43 = vmul.f32 %v1056_v28, %v1090_v55 }
  0x59   :  { %833 = vmatprep.subr.bf16.mxu0 %v832_v16  ;;  %v275_v42 = vadd.f32 %v271_v25, %v267_v9  ;;  %v276_v6 = vadd.f32 %v272_v36, %v268_v14  ;;  %vm221_vm12 = vcmp.eq.f32.partialorder %v1046_v24, 7.0  ;;  %vm222_vm13 = vcmp.eq.f32.partialorder %v1111_v13, 7.0 }
  0x5a   :  { %v1260_v4 = vsel %vm221_vm12, 1.0, %v1540_v2  ;;  %v1263_v48 = vsel %vm222_vm13, 1.0, %v1540_v2  ;;  %v381_v11 = vmul.f32 %v1154_v20, %v1129_v47  ;;  %v382_v46 = vmul.f32 %v1160_v29, %v1136_v58 }
  0x5b   :  { %v283_v5 = vadd.f32 %v279_v37, %v275_v42  ;;  %v284_v53 = vadd.f32 %v280_v38, %v276_v6  ;;  %v385_v23 = vmul.f32 %v1164_v19, %v1157_v26  ;;  %v386_v57 = vmul.f32 %v1167_v30, %v1171_v31 }
  0x5c   :  { %v393_v61 = vmul.f32 %v1174_v32, %v1146_v0  ;;  %v394_v9 = vmul.f32 %v1177_v35, %v1150_v18  ;;  %v401_v14 = vmul.f32 %v1260_v4, %v1138_v8  ;;  %v402_v16 = vmul.f32 %v1263_v48, %v1148_v17 }
  0x5d   :  { %v291_v25 = vadd.f32 %v287_v41, %v283_v5  ;;  %v292_v36 = vadd.f32 %v288_v43, %v284_v53  ;;  %v389_v37 = vadd.f32 %v385_v23, %v381_v11  ;;  %v390_v38 = vadd.f32 %v386_v57, %v382_v46 }
  0x5e   :  { %vm137_vm14 = vcmp.eq.f32.partialorder %v1046_v24, 0.0  ;;  %vm138_vm15 = vcmp.eq.f32.partialorder %v1111_v13, 0.0  ;;  %vm149_vm2 = vcmp.eq.f32.partialorder %v1046_v24, 1.0  ;;  %vm150_vm3 = vcmp.eq.f32.partialorder %v1111_v13, 1.0 }
  0x5f   :  { %v834_v42 = vpack.c.bf16 %v292_v36, %v291_v25  ;;  %v397_v6 = vadd.f32 %v393_v61, %v389_v37  ;;  %v398_v2 = vadd.f32 %v394_v9, %v390_v38  ;;  %v724_v29 = vsel %vm137_vm14, 1.0, %v1567_v1 }
  0x60   :  { %v725_v20 = vsel %vm138_vm15, 1.0, %v1567_v1  ;;  %v1288_v41 = vsel %vm149_vm2, 1.0, %v1567_v1  ;;  %v1291_v43 = vsel %vm150_vm3, 1.0, %v1567_v1  ;;  %vm161_vm4 = vcmp.eq.f32.partialorder %v1046_v24, 2.0 }
  0x61   :  { %835 = vmatpush3.bf16.msra.mxu0 %v834_v42  ;;  %v405_v11 = vadd.f32 %v401_v14, %v397_v6  ;;  %v406_v46 = vadd.f32 %v402_v16, %v398_v2  ;;  %vm162_vm5 = vcmp.eq.f32.partialorder %v1111_v13, 2.0  ;;  %v1296_v5 = vsel %vm161_vm4, 1.0, %v1567_v1 }
  0x62   :  { %v1299_v53 = vsel %vm162_vm5, 1.0, %v1567_v1  ;;  %v269_v23 = vmul.f32 %v724_v29, %v1129_v47  ;;  %v270_v57 = vmul.f32 %v725_v20, %v1136_v58  ;;  %v273_v61 = vmul.f32 %v1288_v41, %v1157_v26 }
  0x63   :  { %v836_v9 = vpack.c.bf16 %v406_v46, %v405_v11  ;;  %v274_v14 = vmul.f32 %v1291_v43, %v1171_v31  ;;  %v281_v2 = vmul.f32 %v1296_v5, %v1146_v0  ;;  %v282_v16 = vmul.f32 %v1299_v53, %v1150_v18 }
  0x64   :  { %v277_v25 = vadd.f32 %v273_v61, %v269_v23  ;;  %v289_v36 = vmul.f32 %v1134_v52, %v1138_v8  ;;  %v290_v20 = vmul.f32 %v1143_v15, %v1148_v17  ;;  %vm231_vm6 = vcmp.eq.f32.partialorder %v1039_v21, 8.0 }
  0x65   :  { %837 = vmatprep.subr.bf16.mxu0 %v836_v9  ;;  %v278_v29 = vadd.f32 %v274_v14, %v270_v57  ;;  %vm232_vm7 = vcmp.eq.f32.partialorder %v1041_v22, 8.0  ;;  %v1318_v37 = vsel %vm231_vm6, 1.0, %v1567_v1  ;;  %v407_v38 = vmul.f32 %v1069_v39, %v1076_v44 }
  0x66   :  { %v285_v42 = vadd.f32 %v281_v2, %v277_v25  ;;  %v1323_v6 = vsel %vm232_vm7, 1.0, %v1567_v1  ;;  %v408_v11 = vmul.f32 %v1072_v40, %v1078_v45  ;;  %v411_v46 = vmul.f32 %v1081_v49, %v1106_v10 }
  0x67   :  { %v286_v23 = vadd.f32 %v282_v16, %v278_v29  ;;  %v412_v57 = vmul.f32 %v1084_v50, %v1108_v12  ;;  %v419_v61 = vmul.f32 %v1200_v59, %v1102_v3  ;;  %v420_v9 = vmul.f32 %v1203_v60, %v1104_v7 }
  0x68   :  { %v293_v14 = vadd.f32 %v289_v36, %v285_v42  ;;  %v415_v2 = vadd.f32 %v411_v46, %v407_v38  ;;  %v427_v25 = vmul.f32 %v1318_v37, %v1088_v54  ;;  %v428_v40 = vmul.f32 %v1323_v6, %v1090_v55 }
  0x69   :  { %v294_v39 = vadd.f32 %v290_v20, %v286_v23  ;;  %v416_v49 = vadd.f32 %v412_v57, %v408_v11  ;;  %v295_v16 = vmul.f32 %v1231_v62, %v1076_v44  ;;  %v296_v29 = vmul.f32 %v1234_v51, %v1078_v45 }
  0x6a   :  { %v423_v59 = vadd.f32 %v419_v61, %v415_v2  ;;  %v299_v60 = vmul.f32 %v1238_v56, %v1106_v10  ;;  %v300_v36 = vmul.f32 %v1243_v63, %v1108_v12  ;;  %v307_v38 = vmul.f32 %v1053_v27, %v1102_v3 }
  0x6b   :  { %v838_v42 = vpack.c.bf16 %v294_v39, %v293_v14  ;;  %v424_v46 = vadd.f32 %v420_v9, %v416_v49  ;;  %v308_v20 = vmul.f32 %v1056_v28, %v1104_v7  ;;  %v315_v62 = vmul.f32 %v1061_v33, %v1088_v54 }
  0x6c   :  { %v431_v11 = vadd.f32 %v427_v25, %v423_v59  ;;  %v303_v51 = vadd.f32 %v299_v60, %v295_v16  ;;  %v304_v23 = vadd.f32 %v300_v36, %v296_v29  ;;  %v316_v57 = vmul.f32 %v1064_v34, %v1090_v55 }
  0x6d   :  { %839 = vmatpush3.bf16.msra.mxu0 %v838_v42  ;;  %v432_v61 = vadd.f32 %v428_v40, %v424_v46  ;;  %vm233_vm8 = vcmp.eq.f32.partialorder %v1046_v24, 8.0  ;;  %vm234_vm9 = vcmp.eq.f32.partialorder %v1111_v13, 8.0  ;;  %v409_v39 = vmul.f32 %v1164_v19, %v1129_v47 }
  0x6e   :  { %v311_v49 = vadd.f32 %v307_v38, %v303_v51  ;;  %v312_v9 = vadd.f32 %v308_v20, %v304_v23  ;;  %v1360_v14 = vsel %vm233_vm8, 1.0, %v1567_v1  ;;  %v1363_v59 = vsel %vm234_vm9, 1.0, %v1567_v1 }
  0x6f   :  { %v840_v60 = vpack.c.bf16 %v432_v61, %v431_v11  ;;  %v410_v2 = vmul.f32 %v1167_v30, %v1136_v58  ;;  %v413_v40 = vmul.f32 %v1174_v32, %v1157_v26  ;;  %v414_v25 = vmul.f32 %v1177_v35, %v1171_v31 }
  0x70   :  { %v319_v16 = vadd.f32 %v315_v62, %v311_v49  ;;  %v320_v29 = vadd.f32 %v316_v57, %v312_v9  ;;  %v421_v36 = vmul.f32 %v1260_v4, %v1146_v0  ;;  %v422_v38 = vmul.f32 %v1263_v48, %v1150_v18 }
  0x71   :  { %841 = vmatprep.subr.bf16.mxu0 %v840_v60  ;;  %v417_v42 = vadd.f32 %v413_v40, %v409_v39  ;;  %v418_v46 = vadd.f32 %v414_v25, %v410_v2  ;;  %v429_v20 = vmul.f32 %v1360_v14, %v1138_v8  ;;  %v430_v11 = vmul.f32 %v1363_v59, %v1148_v17 }
  0x72   :  { %v842_v51 = vpack.c.bf16 %v320_v29, %v319_v16  ;;  %v297_v62 = vmul.f32 %v1288_v41, %v1129_v47  ;;  %v298_v23 = vmul.f32 %v1291_v43, %v1136_v58  ;;  %v301_v57 = vmul.f32 %v1296_v5, %v1157_v26  ;;  %v1568_v41 = vld [vmem:[#allocation15_spill] sm:$0xff]  ;;  %v1569_v43 = vld [vmem:[#allocation16_spill] sm:$0xff] }
  0x73   :  { %v425_v61 = vadd.f32 %v421_v36, %v417_v42  ;;  %v426_v49 = vadd.f32 %v422_v38, %v418_v46  ;;  %v302_v39 = vmul.f32 %v1299_v53, %v1171_v31  ;;  %v309_v9 = vmul.f32 %v1134_v52, %v1146_v0  ;;  %v1570_v46 = vld [vmem:[#allocation14_spill] sm:$0xff] }
  0x74   :  { %843 = vmatpush3.bf16.msra.mxu0 %v842_v51  ;;  %v305_v60 = vadd.f32 %v301_v57, %v297_v62  ;;  %v310_v2 = vmul.f32 %v1143_v15, %v1150_v18  ;;  %v317_v40 = vmul.f32 %v1568_v41, %v1138_v8  ;;  %v318_v25 = vmul.f32 %v1569_v43, %v1148_v17 }
  0x75   :  { %v433_v16 = vadd.f32 %v429_v20, %v425_v61  ;;  %v434_v29 = vadd.f32 %v430_v11, %v426_v49  ;;  %v306_v36 = vadd.f32 %v302_v39, %v298_v23  ;;  %vm243_vm10 = vcmp.eq.f32.partialorder %v1039_v21, 9.0  ;;  %v1571_v11 = vld [vmem:[#allocation19_spill] sm:$0xff]  ;;  %v1572_v61 = vld [vmem:[#allocation20_spill] sm:$0xff] }
  0x76   :  { %v313_v38 = vadd.f32 %v309_v9, %v305_v60  ;;  %vm244_vm11 = vcmp.eq.f32.partialorder %v1041_v22, 9.0  ;;  %v758_v42 = vsel %vm243_vm10, 1.0, %v1567_v1  ;;  %v435_v51 = vmul.f32 %v1570_v46, %v1076_v44 }
  0x77   :  { %v844_v62 = vpack.c.bf16 %v434_v29, %v433_v16  ;;  %v314_v57 = vadd.f32 %v310_v2, %v306_v36  ;;  %v759_v30 = vsel %vm244_vm11, 1.0, %v1567_v1  ;;  %v436_v19 = vmul.f32 %v1084_v50, %v1078_v45 }
  0x78   :  { %v321_v20 = vadd.f32 %v317_v40, %v313_v38  ;;  %v439_v23 = vmul.f32 %v1571_v11, %v1106_v10  ;;  %v440_v49 = vmul.f32 %v1572_v61, %v1108_v12  ;;  %v447_v39 = vmul.f32 %v1318_v37, %v1102_v3 }
  0x79   :  { %845 = vmatprep.subr.bf16.mxu0 %v844_v62  ;;  %v322_v9 = vadd.f32 %v318_v25, %v314_v57  ;;  %v448_v60 = vmul.f32 %v1323_v6, %v1104_v7  ;;  %v455_v2 = vmul.f32 %v758_v42, %v1088_v54  ;;  %v456_v16 = vmul.f32 %v759_v30, %v1090_v55 }
  0x7a   :  { %v443_v50 = vadd.f32 %v439_v23, %v435_v51  ;;  %v444_v40 = vadd.f32 %v440_v49, %v436_v19  ;;  %v323_v29 = vmul.f32 %v1238_v56, %v1076_v44  ;;  %v324_v36 = vmul.f32 %v1243_v63, %v1078_v45  ;;  %v1573_v56 = vld [vmem:[#allocation12_spill] sm:$0xff]  ;;  %v1574_v23 = vld [vmem:[#allocation13_spill] sm:$0xff] }
  0x7b   :  { %v846_v38 = vpack.c.bf16 %v322_v9, %v321_v20  ;;  %v327_v46 = vmul.f32 %v1053_v27, %v1106_v10  ;;  %v328_v25 = vmul.f32 %v1056_v28, %v1108_v12  ;;  %v335_v62 = vmul.f32 %v1061_v33, %v1102_v3 }
  0x7c   :  { %v451_v57 = vadd.f32 %v447_v39, %v443_v50  ;;  %v452_v43 = vadd.f32 %v448_v60, %v444_v40  ;;  %v336_v19 = vmul.f32 %v1064_v34, %v1104_v7  ;;  %v343_v51 = vmul.f32 %v1573_v56, %v1088_v54 }
  0x7d   :  { %847 = vmatpush3.bf16.msra.mxu0 %v846_v38  ;;  %v331_v63 = vadd.f32 %v327_v46, %v323_v29  ;;  %v332_v20 = vadd.f32 %v328_v25, %v324_v36  ;;  %v344_v27 = vmul.f32 %v1574_v23, %v1090_v55  ;;  %vm255_vm12 = vcmp.eq.f32.partialorder %v1039_v21, 10.0 }
  0x7e   :  { %v459_v28 = vadd.f32 %v455_v2, %v451_v57  ;;  %v460_v49 = vadd.f32 %v456_v16, %v452_v43  ;;  %vm256_vm13 = vcmp.eq.f32.partialorder %v1041_v22, 10.0  ;;  %v762_v33 = vsel %vm255_vm12, 1.0, %v1567_v1 }
  0x7f   :  { %v339_v39 = vadd.f32 %v335_v62, %v331_v63  ;;  %v340_v9 = vadd.f32 %v336_v19, %v332_v20  ;;  %v763_v34 = vsel %vm256_vm13, 1.0, %v1567_v1  ;;  %v463_v60 = vmul.f32 %v1571_v11, %v1076_v44 }
  0x80   :  { %v848_v50 = vpack.c.bf16 %v460_v49, %v459_v28  ;;  %v464_v40 = vmul.f32 %v1572_v61, %v1078_v45  ;;  %v467_v21 = vmul.f32 %v1318_v37, %v1106_v10  ;;  %v468_v43 = vmul.f32 %v1323_v6, %v1108_v12  ;;  %v1575_v28 = vld [vmem:[#allocation16_spill] sm:$0xff] }
  0x81   :  { %v347_v22 = vadd.f32 %v343_v51, %v339_v39  ;;  %v348_v2 = vadd.f32 %v344_v27, %v340_v9  ;;  %v475_v16 = vmul.f32 %v758_v42, %v1102_v3  ;;  %v476_v29 = vmul.f32 %v759_v30, %v1104_v7  ;;  %v1576_v39 = vld [vmem:[#allocation17_spill] sm:$0xff]  ;;  %v1577_v9 = vld [vmem:[#allocation18_spill] sm:$0xff] }
  0x82   :  { %849 = vmatprep.subr.bf16.mxu0 %v848_v50  ;;  %v471_v36 = vadd.f32 %v467_v21, %v463_v60  ;;  %v472_v38 = vadd.f32 %v468_v43, %v464_v40  ;;  %v483_v44 = vmul.f32 %v762_v33, %v1088_v54  ;;  %v484_v11 = vmul.f32 %v763_v34, %v1090_v55 }
  0x83   :  { %v850_v45 = vpack.c.bf16 %v348_v2, %v347_v22  ;;  %vm245_vm14 = vcmp.eq.f32.partialorder %v1046_v24, 9.0  ;;  %vm246_vm15 = vcmp.eq.f32.partialorder %v1111_v13, 9.0  ;;  %v437_v10 = vmul.f32 %v1174_v32, %v1129_v47 }
  0x84   :  { %v479_v12 = vadd.f32 %v475_v16, %v471_v36  ;;  %v480_v37 = vadd.f32 %v476_v29, %v472_v38  ;;  %v760_v3 = vsel %vm245_vm14, 1.0, %v1567_v1  ;;  %v761_v7 = vsel %vm246_vm15, 1.0, %v1567_v1 }
  0x85   :  { %851 = vmatpush3.bf16.msra.mxu0 %v850_v45  ;;  %v438_v54 = vmul.f32 %v1177_v35, %v1136_v58  ;;  %v441_v55 = vmul.f32 %v1260_v4, %v1157_v26  ;;  %v442_v30 = vmul.f32 %v1263_v48, %v1171_v31  ;;  %v449_v6 = vmul.f32 %v1360_v14, %v1146_v0 }
  0x86   :  { %v487_v32 = vadd.f32 %v483_v44, %v479_v12  ;;  %v488_v42 = vadd.f32 %v484_v11, %v480_v37  ;;  %v450_v61 = vmul.f32 %v1363_v59, %v1150_v18  ;;  %v457_v46 = vmul.f32 %v760_v3, %v1138_v8  ;;  %v495_v11 = vld [vmem:[#allocation5 + $0x20] sm:$0xff] }
  0x87   :  { %v445_v25 = vadd.f32 %v441_v55, %v437_v10  ;;  %v446_v62 = vadd.f32 %v442_v30, %v438_v54  ;;  %v458_v35 = vmul.f32 %v761_v7, %v1148_v17  ;;  %v325_v57 = vmul.f32 %v1296_v5, %v1129_v47 }
  0x88   :  { %v856_v19 = vpack.c.bf16 %v488_v42, %v487_v32  ;;  %v326_v56 = vmul.f32 %v1299_v53, %v1136_v58  ;;  %v329_v51 = vmul.f32 %v1134_v52, %v1157_v26  ;;  %v330_v63 = vmul.f32 %v1143_v15, %v1171_v31 }
  0x89   :  { %v453_v20 = vadd.f32 %v449_v6, %v445_v25  ;;  %v454_v23 = vadd.f32 %v450_v61, %v446_v62  ;;  %v337_v27 = vmul.f32 %v1568_v41, %v1146_v0  ;;  %v338_v49 = vmul.f32 %v1575_v28, %v1150_v18 }
  0x8a   :  { %857 = vmatprep.subr.bf16.mxu1 %v856_v19  ;;  %v333_v5 = vadd.f32 %v329_v51, %v325_v57  ;;  %v334_v33 = vadd.f32 %v330_v63, %v326_v56  ;;  %v345_v53 = vmul.f32 %v1576_v39, %v1138_v8  ;;  %v346_v52 = vmul.f32 %v1577_v9, %v1148_v17 }
  0x8b   :  { %859 = vmatpush3.bf16.msra.mxu1 %v856_v19  ;;  %v461_v34 = vadd.f32 %v457_v46, %v453_v20  ;;  %v462_v15 = vadd.f32 %v458_v35, %v454_v23  ;;  %vm257_vm2 = vcmp.eq.f32.partialorder %v1046_v24, 10.0  ;;  %vm258_vm3 = vcmp.eq.f32.partialorder %v1111_v13, 10.0 }
  0x8c   :  { %v341_v41 = vadd.f32 %v337_v27, %v333_v5  ;;  %v342_v60 = vadd.f32 %v338_v49, %v334_v33  ;;  %v764_v50 = vsel %vm257_vm2, 1.0, %v1567_v1  ;;  %v765_v40 = vsel %vm258_vm3, 1.0, %v1567_v1 }
  0x8d   :  { %v852_v21 = vpack.c.bf16 %v462_v15, %v461_v34  ;;  %v465_v43 = vmul.f32 %v1260_v4, %v1129_v47  ;;  %v466_v22 = vmul.f32 %v1263_v48, %v1136_v58  ;;  %v469_v2 = vmul.f32 %v1360_v14, %v1157_v26  ;;  %v491_v14 = vld [vmem:[#allocation5] sm:$0xff] }
  0x8e   :  { %v349_v16 = vadd.f32 %v345_v53, %v341_v41  ;;  %v350_v24 = vadd.f32 %v346_v52, %v342_v60  ;;  %v470_v13 = vmul.f32 %v1363_v59, %v1171_v31  ;;  %v477_v29 = vmul.f32 %v760_v3, %v1146_v0  ;;  %v494_v0 = vld [vmem:[#allocation5 + $0x18] sm:$0xff] }
  0x8f   :  { %853 = vmatprep.subr.bf16.mxu0 %v852_v21  ;;  %v473_v36 = vadd.f32 %v469_v2, %v465_v43  ;;  %v478_v1 = vmul.f32 %v761_v7, %v1150_v18  ;;  %v485_v38 = vmul.f32 %v764_v50, %v1138_v8  ;;  %v486_v58 = vmul.f32 %v765_v40, %v1148_v17  ;;  %v496_v18 = vld [vmem:[#allocation5 + $0x28] sm:$0xff] }
  0x90   :  { %v854_v47 = vpack.c.bf16 %v350_v24, %v349_v16  ;;  %v474_v4 = vadd.f32 %v470_v13, %v466_v22 }
  0x91   :  { %v481_v48 = vadd.f32 %v477_v29, %v473_v36 }
  0x92   :  { %855 = vmatpush3.bf16.msra.mxu0 %v854_v47  ;;  %v482_v26 = vadd.f32 %v478_v1, %v474_v4 }
  0x93   :  { %v489_v44 = vadd.f32 %v485_v38, %v481_v48 }
  0x94   :  { %v490_v45 = vadd.f32 %v486_v58, %v482_v26 }
  0x95   :  { %569 = vmatmul.mubr.f32.vlgmr.msra.gmra.mrb[0].mxu0 %v491_v14 }
  0x96   :  { %v860_v31 = vpack.c.bf16 %v490_v45, %v489_v44  ;;  %573 = vmatprep.mubr.f32.mxu0 %v495_v11 }
  0x98   :  { %861 = vmatprep.subr.bf16.mxu1 %v860_v31 }
  0x99   :  { %863 = vmatpush3.bf16.msra.mxu1 %v860_v31  ;;  %574 = vmatmul.mubr.f32.gmra.mrb[2].mxu0 %v494_v0 }
  0x9c   :  { %822 = vmatmul.mubr.msk.f32.vlgmr.msra.gmra.mrb[0].mxu1 %vm497_vm1, %v496_v18  ;;  %vm687_vm1 = vcmask 7168  }
  0xba   :  { %v668_v42 = vpop.xlane.xlu0 %667 }
  0xbb   :  { %880 = vrcp.f32 %v668_v42 }
  0xc5   :  { %v881_v61 = vpop.eup %880 }
 0x168   :  { %v801_v8 = vpop.f32.mrb[0].mxu0 }
 0x169   :  { %v802_v59 = vpop.f32.mrb[1].mxu0 }
 0x16a   :  { %v803_v17 = vadd.f32 %v802_v59, %v801_v8 }
 0x16c   :  { %v804_v10 = vpop.f32.mrb[2].mxu0 }
 0x16d   :  { %v805_v12 = vpop.f32.mrb[3].mxu0 }
 0x16e   :  { %v806_v37 = vadd.f32 %v805_v12, %v804_v10 }
 0x16f   :  { %v823_v3 = vpop.f32.mrb[0].mxu1 }
 0x170   :  { %v645_v7 = vpop.f32.mrb[1].mxu1  ;;  %v651_v54 = vadd.f32 %v823_v3, %v806_v37 }
 0x171   :  { %v646_v55 = vadd.f32 %v803_v17, %v645_v7 }
 0x172   :  { %655 = vst [vmem:[#allocation7 + $0x8] sm:$0xff] %v651_v54  ;;  %v665_v6 = vsel %vm661_vm0, %v651_v54, 0.0 }
 0x173   :  { %654 = vst [vmem:[#allocation7] sm:$0xff] %v646_v55  ;;  %v664_v32 = vsel %vm661_vm0, %v646_v55, 0.0  ;;  %671 = vadd.xlane.f32.xlu1 %v665_v6 }
 0x174   :  { %669 = vadd.xlane.f32.xlu0 %v664_v32 }
 0x200   :  { %v672_v46 = vpop.xlane.xlu1 %671 }
 0x201   :  { %v670_v25 = vpop.xlane.xlu0 %669  ;;  %v676_v62 = vmul.f32 %v881_v61, %v672_v46  ;;  %689 = vst.msk [vmem:[%s1538_s3 + $0x8] sm:$0xff] %vm687_vm1, %v672_v46 }
 0x202   :  { %v675_v35 = vmul.f32 %v881_v61, %v670_v25  ;;  %688 = vst.msk [vmem:[%s1538_s3] sm:$0xff] %vm687_vm1, %v670_v25 }
 0x203   :  { %v678_v57 = vsub.f32 %v651_v54, %v676_v62 }
 0x204   :  { %v677_v19 = vsub.f32 %v646_v55, %v675_v35 }
 0x205   :  { %v680_v56 = vsel %vm661_vm0, %v678_v57, 0.0 }
 0x206   :  { %v679_v51 = vsel %vm661_vm0, %v677_v19, 0.0  ;;  %v682_v63 = vmul.f32 %v680_v56, %v680_v56 }
 0x207   :  { %v681_v20 = vmul.f32 %v679_v51, %v679_v51 }
 0x208   :  { %685 = vadd.xlane.f32.xlu0 %v682_v63 }
 0x209   :  { %683 = vadd.xlane.f32.xlu1 %v681_v20 }
 0x20a   :  { %937 = shalt.err (!%p934_p6)
}
 0x20b   :  { %s938_s23 = scalar_lea.hbm %s1537_s2, 256 }
 0x20c   :  { %p939_p7 = scmp.ne.s32.totalorder %s1537_s2, %s938_s23  ;;  %p942_p8 = scmp.lt.u32.totalorder %s938_s23, %s1537_s2 }
 0x20e   :  { %p944_p9 = pnand %p942_p8, %p939_p7 }
 0x210   :  { %947 = shalt.err (!%p944_p9)
}
 0x211   :  { %703 = dma.vmem_to_hbm [thread:$0]  %s698_s20, 256, %s1537_s2, [#allocation4], %s955_s25, %s955_s25, %s956_s26  }
 0x295   :  { %v686_v23 = vpop.xlane.xlu0 %685 }
 0x296   :  { %v684_v27 = vpop.xlane.xlu1 %683  ;;  %691 = vst.msk [vmem:[%s1539_s4 + $0x8] sm:$0xff] %vm687_vm1, %v686_v23 }
 0x297   :  { %690 = vst.msk [vmem:[%s1539_s4] sm:$0xff] %vm687_vm1, %v684_v27 }
 0x298   :  { %952 = dma.done.wait [#allocation4], 256  }
 0x299   :  { %953 = vsyncadd [#allocation4], 4294967040 }
 0x29a   :  { %715 = vsyncpa [#allocation3], 1 }
 0x29b   :  { %716 = vsyncpa [#allocation6], 1 }
 0x29c   :  { %717 = vsyncpa [#allocation4], 1 }

</bundles_post_ra>
